<compile_context>
chip_gen: v7x
topology: tpu7x:2x2x1
jax: 0.10.0
libtpu: 0.0.40
codegen_flags: <defaults>
</compile_context>

<pallas_src>
import math

import jax
import jax.numpy as jnp
from jax.experimental import pallas as pl
from jax.experimental.pallas import tpu as pltpu

NUM_FRAMES = 5
NUM_FEATURES = 7
NUM_JOINTS = 32
IN_FEATURES = NUM_JOINTS * NUM_FEATURES  # 224


def _embed_pe_kernel(x_ref, w_ref, bpe_ref, o_ref):
    # x_ref  : (tr, F_in)  row tile of the flattened (B*T, F_in) input
    # w_ref  : (F_in, D)   shared weight (pre-transposed), constant index_map
    # bpe_ref: (tr, D)     bias + positional encoding for one row tile, constant index_map
    # o_ref  : (tr, D)
    y = jnp.dot(x_ref[...], w_ref[...], preferred_element_type=jnp.float32)  # MXU
    o_ref[...] = (y + bpe_ref[...]).astype(o_ref.dtype)                      # single VPU add


def custom_transformer_input(x, weight_t, bias, pe, *, row_tile=2048):
    """x: (B, T, IN_FEATURES), weight_t: (IN_FEATURES, D), bias: (D,), pe: (max_len, D)."""
    B, T, F_in = x.shape
    D = weight_t.shape[1]
    assert T <= pe.shape[0], "seq_len exceeds positional-encoding max_len"

    R = B * T
    x2d = x.reshape(R, F_in)

    # Fuse bias into the positional encoding once: (T, D). Never tiled to (B*T, D).
    bpe = bias[None, :].astype(jnp.float32) + pe[:T].astype(jnp.float32)     # (T, D)

    if R <= row_tile:
        # Tiny/medium problem: single grid step, full-extent blocks. Entirely
        # fixed-overhead-bound; splitting across a grid would be pure overhead.
        tr = R
        grid = (1,)
        bpe_block = jnp.tile(bpe, (B, 1))                                    # (R, D)
    else:
        # Large-batch path: row tile is a multiple of lcm(8, T) so that
        #   * sublanes stay aligned (multiple of 8), and
        #   * (row % T) is the same within every tile, so one (tr, D) bias+PE
        #     block with a constant index_map serves all tiles.
        # Rounding DOWN keeps tr <= row_tile < R, guaranteeing >= 2 grid steps
        # along the "parallel" axis (both v7x TensorCores get work).
        lcm8t = (8 * T) // math.gcd(8, T)
        tr = max(lcm8t, (row_tile // lcm8t) * lcm8t)
        grid = (pl.cdiv(R, tr),)
        bpe_block = jnp.tile(bpe, (tr // T, 1))                              # (tr, D)
    # No padding / output slicing: Pallas clamps the ragged last block's input
    # reads to the array and masks its out-of-range output stores.

    # VMEM budget: double-buffered x / out / bpe tiles + weight, ~1.5x headroom,
    # capped well under physical VMEM (v7x has only 64 MiB total per core).
    est = 4 * (2 * tr * F_in + 2 * tr * D + 2 * tr * D + 2 * F_in * D)
    vmem_limit = min(max(int(1.5 * est), 4 << 20), 48 << 20)

    out2d = pl.pallas_call(
        _embed_pe_kernel,
        out_shape=jax.ShapeDtypeStruct((R, D), jnp.float32),
        grid=grid,
        in_specs=[
            pl.BlockSpec((tr, F_in), lambda i: (i, 0)),   # row tile of x
            pl.BlockSpec((F_in, D), lambda i: (0, 0)),    # weight, resident
            pl.BlockSpec((tr, D), lambda i: (0, 0)),      # bias+PE tile, resident
        ],
        out_specs=pl.BlockSpec((tr, D), lambda i: (i, 0)),
        compiler_params=pltpu.CompilerParams(
            dimension_semantics=("parallel",),
            vmem_limit_bytes=vmem_limit,
        ),
    )(x2d, weight_t, bpe_block)

    # TODO(synk): if the downstream consumer accepts a lane-dense layout
    # (D=32 < 128 lanes), expose (B, T*D) instead to avoid masked stores.
    return out2d.reshape(B, T, D)


def make_positional_encoding(d_model, max_len=NUM_FRAMES):
    position = jnp.arange(max_len, dtype=jnp.float32)[:, None]           # (max_len, 1)
    div_term = jnp.exp(jnp.arange(0, d_model, 2, dtype=jnp.float32)
                       * (-math.log(10000.0) / d_model))                 # (d_model/2,)
    pe = jnp.zeros((max_len, d_model), dtype=jnp.float32)
    pe = pe.at[:, 0::2].set(jnp.sin(position * div_term))
    pe = pe.at[:, 1::2].set(jnp.cos(position * div_term))
    return pe


if __name__ == "__main__":
    d_model = 32
    batch = 2
    seq_len = NUM_FRAMES

    key = jax.random.PRNGKey(0)
    k_x, k_w, k_b, k_x2 = jax.random.split(key, 4)

    # Deterministic parameter init (mimics nn.Linear's uniform(-1/sqrt(fan_in), +)).
    bound = 1.0 / math.sqrt(IN_FEATURES)
    weight = jax.random.uniform(k_w, (d_model, IN_FEATURES),
                                minval=-bound, maxval=bound, dtype=jnp.float32)
    bias = jax.random.uniform(k_b, (d_model,),
                              minval=-bound, maxval=bound, dtype=jnp.float32)
    pe = make_positional_encoding(d_model, max_len=NUM_FRAMES)

    # --- small-shape path (single grid step) ---
    x = jax.random.normal(k_x, (batch, seq_len, IN_FEATURES), dtype=jnp.float32)
    out = custom_transformer_input(x, weight.T, bias, pe)
    out = jax.block_until_ready(out)

    ref = x @ weight.T + bias + pe[:seq_len]
    assert out.shape == (batch, seq_len, d_model)
    assert jnp.allclose(out, ref, atol=1e-5, rtol=1e-5), "mismatch vs reference (small path)"

    # --- exercise the tiled large-B path cheaply (ragged last block, >=2 steps) ---
    xb = jax.random.normal(k_x2, (13, seq_len, IN_FEATURES), dtype=jnp.float32)  # R=65
    out_b = custom_transformer_input(xb, weight.T, bias, pe, row_tile=40)
    out_b = jax.block_until_ready(out_b)

    ref_b = xb @ weight.T + bias + pe[:seq_len]
    assert out_b.shape == (13, seq_len, d_model)
    assert jnp.allclose(out_b, ref_b, atol=1e-5, rtol=1e-5), "mismatch vs reference (tiled path)"

    print("KERNEL_OK")
</pallas_src>

<mosaic_0001>
module attributes {stable_mosaic.version = 11 : i64} {
  func.func @_embed_pe_kernel(%arg0: i32, %arg1: memref<10x224xf32, #tpu.memory_space<vmem>>, %arg2: memref<224x32xf32, #tpu.memory_space<vmem>>, %arg3: memref<10x32xf32, #tpu.memory_space<vmem>>, %arg4: memref<10x32xf32, #tpu.memory_space<vmem>>) attributes {dimension_semantics = [#tpu.dimension_semantics<parallel>], iteration_bounds = array<i64: 1>, scalar_prefetch = 0 : i64, scratch_operands = 0 : i64, tpu.core_type = #tpu.core_type<tc>, window_params = [{transform_indices = @transform_0, window_bounds = array<i64: 10, 224>}, {pipeline_mode = #tpu.pipeline_mode<synchronous>, transform_indices = @transform_1, window_bounds = array<i64: 224, 32>}, {pipeline_mode = #tpu.pipeline_mode<synchronous>, transform_indices = @transform_2, window_bounds = array<i64: 10, 32>}, {transform_indices = @transform_3, window_bounds = array<i64: 10, 32>}]} {
    %c0 = arith.constant 0 : index
    %c0_0 = arith.constant 0 : index
    %0 = vector.load %arg1[%c0, %c0_0] : memref<10x224xf32, #tpu.memory_space<vmem>>, vector<10x224xf32>
    %c0_1 = arith.constant 0 : index
    %c0_2 = arith.constant 0 : index
    %1 = vector.load %arg2[%c0_1, %c0_2] : memref<224x32xf32, #tpu.memory_space<vmem>>, vector<224x32xf32>
    %cst = arith.constant dense<0.000000e+00> : vector<10x32xf32>
    %2 = tpu.matmul %0, %1, %cst {dimension_numbers = #tpu.dot_dimension_numbers<[1], [0], [0], [1], [0, 0, 1, 1], [], []>} : vector<10x224xf32>, vector<224x32xf32>, vector<10x32xf32> -> vector<10x32xf32>
    %c0_3 = arith.constant 0 : index
    %c0_4 = arith.constant 0 : index
    %3 = vector.load %arg3[%c0_3, %c0_4] : memref<10x32xf32, #tpu.memory_space<vmem>>, vector<10x32xf32>
    %4 = arith.addf %2, %3 : vector<10x32xf32>
    %c0_5 = arith.constant 0 : index
    %c0_6 = arith.constant 0 : index
    %5 = vector.load %arg4[%c0_5, %c0_6] : memref<10x32xf32, #tpu.memory_space<vmem>>, vector<10x32xf32>
    tpu.vector_store %arg4[%c0_5, %c0_6], %4 {strides = array<i32>} : memref<10x32xf32, #tpu.memory_space<vmem>>, vector<10x32xf32>,
    return
  }
  func.func @transform_0(%arg0: i32) -> (i32, i32) {
    %c0_i32 = arith.constant 0 : i32
    %c0_i32_0 = arith.constant 0 : i32
    return %arg0, %c0_i32 : i32, i32
  }
  func.func @transform_1(%arg0: i32) -> (i32, i32) {
    %c0_i32 = arith.constant 0 : i32
    %c0_i32_0 = arith.constant 0 : i32
    %c0_i32_1 = arith.constant 0 : i32
    return %c0_i32, %c0_i32_0 : i32, i32
  }
  func.func @transform_2(%arg0: i32) -> (i32, i32) {
    %c0_i32 = arith.constant 0 : i32
    %c0_i32_0 = arith.constant 0 : i32
    %c0_i32_1 = arith.constant 0 : i32
    return %c0_i32, %c0_i32_0 : i32, i32
  }
  func.func @transform_3(%arg0: i32) -> (i32, i32) {
    %c0_i32 = arith.constant 0 : i32
    %c0_i32_0 = arith.constant 0 : i32
    return %arg0, %c0_i32 : i32, i32
  }
}

</mosaic_0001>

<bundles_post_ra>
// kernel: tpu_custom_call.1
= control target key start
LH: loop header
LB: loop body
LE: loop exit
PB: predicated region body
PF: predicated region fallthrough
CT: control target
= control target key end

     0   :  { %v251_v3 = vmov 0.0|0.0   ;;  %vm49_vm0 = vcmask 785408   ;;  %s417_s0 = inlined_call_operand.vmem [shape: f32[10,224], index: 0, kind: input, shape index: {}]   ;;  %s418_s1 = inlined_call_operand.vmem [shape: f32[224,32], index: 1, kind: input, shape index: {}]   ;;  %s419_s2 = inlined_call_operand.vmem [shape: f32[10,32], index: 2, kind: input, shape index: {}]   ;;  %s420_s3 = inlined_call_operand.hbm [shape: f32[10,32], index: 3, kind: output, shape index: {}]  }
   0x1   :  { %v19_v0 = vld [vmem:[%s418_s1] sm:$0xff]  ;;  %v20_v1 = vld [vmem:[%s418_s1 + $0x8] sm:$0xff]  ;;  %v21_v2 = vld [vmem:[%s418_s1 + $0x10] sm:$0xff]  ;;  %153 = vmatprep.subr.bf16.mxu0 %v251_v3  ;;  %195 = vmatprep.subr.bf16.mxu1 %v251_v3 }
   0x2   :  { %v154_v4 = vpack.c.bf16 %v20_v1, %v19_v0  ;;  %v22_v5 = vld [vmem:[%s418_s1 + $0x18] sm:$0xff]  ;;  %v23_v7 = vld [vmem:[%s418_s1 + $0x20] sm:$0xff]  ;;  %v24_v8 = vld [vmem:[%s418_s1 + $0x28] sm:$0xff] }
   0x3   :  { %v157_v6 = vpack.c.bf16 %v22_v5, %v21_v2  ;;  %v160_v9 = vpack.c.bf16 %v24_v8, %v23_v7  ;;  %v25_v10 = vld [vmem:[%s418_s1 + $0x30] sm:$0xff]  ;;  %v26_v11 = vld [vmem:[%s418_s1 + $0x38] sm:$0xff]  ;;  %v16_v12 = vld [vmem:[%s417_s0 + $0x8] sm:$0xff] }
   0x4   :  { %155 = vmatpush1.bf16.msra.mxu0 %v154_v4  ;;  %209 = vmatpush1.bf16.msra.mxu1 %v154_v4  ;;  %v18_v13 = vld [vmem:[%s417_s0 + $0x18] sm:$0x3]  ;;  %v163_v14 = vpack.c.bf16 %v26_v11, %v25_v10 }
   0x5   :  { %156 = vmatprep.subr.bf16.mxu0 %v251_v3  ;;  %196 = vmatprep.subr.bf16.mxu1 %v251_v3 }
   0x6   :  { %151 = vmatprep.mubr.msk.f32.mxu0 %vm49_vm0, %v16_v12  ;;  %152 = vmatprep.mubr.msk.f32.mxu1 %vm49_vm0, %v18_v13 }
   0x8   :  { %158 = vmatpush1.bf16.msra.mxu0 %v157_v6  ;;  %210 = vmatpush1.bf16.msra.mxu1 %v157_v6 }
   0x9   :  { %159 = vmatprep.subr.bf16.mxu0 %v251_v3  ;;  %197 = vmatprep.subr.bf16.mxu1 %v251_v3 }
   0xc   :  { %161 = vmatpush1.bf16.msra.mxu0 %v160_v9  ;;  %211 = vmatpush1.bf16.msra.mxu1 %v160_v9 }
   0xd   :  { %8 = vsyncpa [#allocation3], 0  ;;  %162 = vmatprep.subr.bf16.mxu0 %v251_v3  ;;  %198 = vmatprep.subr.bf16.mxu1 %v251_v3  ;;  %v27_v15 = vld [vmem:[%s418_s1 + $0x40] sm:$0xff]  ;;  %v28_v16 = vld [vmem:[%s418_s1 + $0x48] sm:$0xff]  ;;  %vm131_vm1 = vcmask 261120   ;;  %vm133_vm2 = vcmask 254976  }
   0xe   :  { %v166_v17 = vpack.c.bf16 %v28_v16, %v27_v15  ;;  %v29_v18 = vld [vmem:[%s418_s1 + $0x50] sm:$0xff]  ;;  %v30_v19 = vld [vmem:[%s418_s1 + $0x58] sm:$0xff]  ;;  %v31_v21 = vld [vmem:[%s418_s1 + $0x60] sm:$0xff] }
   0xf   :  { %v169_v20 = vpack.c.bf16 %v30_v19, %v29_v18  ;;  %v32_v22 = vld [vmem:[%s418_s1 + $0x68] sm:$0xff]  ;;  %v33_v24 = vld [vmem:[%s418_s1 + $0x70] sm:$0xff]  ;;  %v34_v25 = vld [vmem:[%s418_s1 + $0x78] sm:$0xff] }
  0x10   :  { %164 = vmatpush1.bf16.msra.mxu0 %v163_v14  ;;  %212 = vmatpush1.bf16.msra.mxu1 %v163_v14  ;;  %v172_v23 = vpack.c.bf16 %v32_v22, %v31_v21  ;;  %v175_v26 = vpack.c.bf16 %v34_v25, %v33_v24  ;;  %v35_v27 = vld [vmem:[%s418_s1 + $0x80] sm:$0xff]  ;;  %v36_v28 = vld [vmem:[%s418_s1 + $0x88] sm:$0xff]  ;;  %v37_v30 = vld [vmem:[%s418_s1 + $0x90] sm:$0xff] }
  0x11   :  { %165 = vmatprep.subr.bf16.mxu0 %v251_v3  ;;  %199 = vmatprep.subr.bf16.mxu1 %v251_v3  ;;  %v178_v29 = vpack.c.bf16 %v36_v28, %v35_v27  ;;  %v38_v31 = vld [vmem:[%s418_s1 + $0x98] sm:$0xff]  ;;  %v39_v33 = vld [vmem:[%s418_s1 + $0xa0] sm:$0xff]  ;;  %v40_v34 = vld [vmem:[%s418_s1 + $0xa8] sm:$0xff] }
  0x12   :  { %v181_v32 = vpack.c.bf16 %v38_v31, %v37_v30  ;;  %v184_v35 = vpack.c.bf16 %v40_v34, %v39_v33  ;;  %v41_v36 = vld [vmem:[%s418_s1 + $0xb0] sm:$0xff]  ;;  %v42_v37 = vld [vmem:[%s418_s1 + $0xb8] sm:$0xff]  ;;  %v43_v39 = vld [vmem:[%s418_s1 + $0xc0] sm:$0xff] }
  0x13   :  { %v187_v38 = vpack.c.bf16 %v42_v37, %v41_v36  ;;  %v44_v40 = vld [vmem:[%s418_s1 + $0xc8] sm:$0xff]  ;;  %v45_v42 = vld [vmem:[%s418_s1 + $0xd0] sm:$0xff]  ;;  %v46_v43 = vld [vmem:[%s418_s1 + $0xd8] sm:$0xff]  ;;  %s252_s1 = smov [#allocation2]  }
  0x14   :  { %167 = vmatpush1.bf16.msra.mxu0 %v166_v17  ;;  %213 = vmatpush1.bf16.msra.mxu1 %v166_v17  ;;  %v190_v41 = vpack.c.bf16 %v44_v40, %v43_v39  ;;  %v193_v44 = vpack.c.bf16 %v46_v43, %v45_v42  ;;  %v15_v45 = vld [vmem:[%s417_s0] sm:$0xff]  ;;  %v17_v46 = vld [vmem:[%s417_s0 + $0x10] sm:$0x3]  ;;  %s140_s22 = sshll.u32 %s252_s1, 4  ;;  %v48_v48 = vld [vmem:[%s419_s2 + $0x8] sm:$0x3]  ;;  %s141_s22 = int_to_ptr.vmem [resolvable:$true] %s140_s22 }
  0x15   :  { %168 = vmatprep.subr.bf16.mxu0 %v251_v3  ;;  %200 = vmatprep.subr.bf16.mxu1 %v251_v3  ;;  %v47_v47 = vld [vmem:[%s419_s2] sm:$0xff]  ;;  %s227_s0 = scalar_lea.vmem %s141_s22, 256  ;;  %p232_p1 = scmp.lt.s32.totalorder %s141_s22, %s141_s22 }
  0x16   :  { %p228_p0 = scmp.ne.s32.totalorder %s141_s22, %s227_s0  ;;  %p233_p2 = scmp.lt.s32.totalorder %s227_s0, %s227_s0 }
  0x18   :  { %170 = vmatpush1.bf16.msra.mxu0 %v169_v20  ;;  %214 = vmatpush1.bf16.msra.mxu1 %v169_v20  ;;  %p234_p3 = por %p233_p2, %p232_p1 }
  0x19   :  { %171 = vmatprep.subr.bf16.mxu0 %v251_v3  ;;  %201 = vmatprep.subr.bf16.mxu1 %v251_v3 }
  0x1a   :  { %p235_p4 = pnand %p234_p3, %p228_p0 }
  0x1c   :  { %173 = vmatpush1.bf16.msra.mxu0 %v172_v23  ;;  %215 = vmatpush1.bf16.msra.mxu1 %v172_v23 }
  0x1d   :  { %174 = vmatprep.subr.bf16.mxu0 %v251_v3  ;;  %202 = vmatprep.subr.bf16.mxu1 %v251_v3 }
  0x20   :  { %176 = vmatpush1.bf16.msra.mxu0 %v175_v26  ;;  %216 = vmatpush1.bf16.msra.mxu1 %v175_v26 }
  0x21   :  { %177 = vmatprep.subr.bf16.mxu0 %v251_v3  ;;  %203 = vmatprep.subr.bf16.mxu1 %v251_v3 }
  0x24   :  { %179 = vmatpush1.bf16.msra.mxu0 %v178_v29  ;;  %217 = vmatpush1.bf16.msra.mxu1 %v178_v29 }
  0x25   :  { %180 = vmatprep.subr.bf16.mxu0 %v251_v3  ;;  %204 = vmatprep.subr.bf16.mxu1 %v251_v3 }
  0x28   :  { %182 = vmatpush1.bf16.msra.mxu0 %v181_v32  ;;  %218 = vmatpush1.bf16.msra.mxu1 %v181_v32 }
  0x29   :  { %183 = vmatprep.subr.bf16.mxu0 %v251_v3  ;;  %205 = vmatprep.subr.bf16.mxu1 %v251_v3 }
  0x2c   :  { %185 = vmatpush1.bf16.msra.mxu0 %v184_v35  ;;  %219 = vmatpush1.bf16.msra.mxu1 %v184_v35 }
  0x2d   :  { %186 = vmatprep.subr.bf16.mxu0 %v251_v3  ;;  %206 = vmatprep.subr.bf16.mxu1 %v251_v3 }
  0x30   :  { %188 = vmatpush1.bf16.msra.mxu0 %v187_v38  ;;  %220 = vmatpush1.bf16.msra.mxu1 %v187_v38 }
  0x31   :  { %189 = vmatprep.subr.bf16.mxu0 %v251_v3  ;;  %207 = vmatprep.subr.bf16.mxu1 %v251_v3 }
  0x34   :  { %191 = vmatpush1.bf16.msra.mxu0 %v190_v41  ;;  %221 = vmatpush1.bf16.msra.mxu1 %v190_v41 }
  0x35   :  { %192 = vmatprep.subr.bf16.mxu0 %v251_v3  ;;  %208 = vmatprep.subr.bf16.mxu1 %v251_v3 }
  0x38   :  { %194 = vmatpush1.bf16.msra.mxu0 %v193_v44  ;;  %222 = vmatpush1.bf16.msra.mxu1 %v193_v44 }
  0x3b   :  { %121 = vmatmul.mubr.f32.vlgmr.msra.gmra.mrb[0].mxu0 %v15_v45  ;;  %126 = vmatmul.mubr.f32.vlgmr.msra.gmra.mrb[0].mxu1 %v17_v46 }
 0x10e   :  { %v122_v49 = vpop.f32.mrb[0].mxu0  ;;  %v127_v50 = vpop.f32.mrb[0].mxu1 }
 0x10f   :  { %v123_v51 = vadd.f32 %v122_v49, %v47_v47  ;;  %v128_v52 = vadd.f32 %v127_v50, %v48_v48  ;;  %v124_v53 = vpop.f32.mrb[1].mxu0  ;;  %v129_v54 = vpop.f32.mrb[1].mxu1 }
 0x111   :  { %132 = vst.msk [vmem:[#allocation2] sm:$0xff] %vm131_vm1, %v123_v51 }
 0x112   :  { %134 = vst.msk [vmem:[#allocation2 + $0x8] sm:$0x3] %vm133_vm2, %v128_v52 }
 0x113   :  { %238 = shalt.err (!%p235_p4)
}
 0x114   :  { %s239_s28 = scalar_lea.hbm %s420_s3, 256 }
 0x115   :  { %p240_p5 = scmp.ne.s32.totalorder %s420_s3, %s239_s28  ;;  %p243_p6 = scmp.lt.u32.totalorder %s239_s28, %s420_s3 }
 0x117   :  { %p245_p7 = pnand %p243_p6, %p240_p5 }
 0x119   :  { %248 = shalt.err (!%p245_p7)
}
 0x11a   :  { %s253_s6 = smov 128   ;;  %s254_s7 = smov 8  }
 0x11b   :  { %146 = dma.vmem_to_hbm [thread:$0]  %s141_s22, 256, %s420_s3, [#allocation3], %s253_s6, %s253_s6, %s254_s7  }
 0x11c   :  { %249 = dma.done.wait [#allocation3], 256  }
 0x11d   :  { %250 = vsyncadd [#allocation3], 4294967040 }
 0x11e   :  { %150 = vsyncpa [#allocation3], 1 }

</bundles_post_ra>
